<compile_context>
chip_gen: v7x
topology: tpu7x:2x2x1
jax: 0.10.0
libtpu: 0.0.40
codegen_flags: <defaults>
</compile_context>

<pallas_src>
import functools

import jax
import jax.numpy as jnp
from jax.experimental import pallas as pl
from jax.experimental.pallas import tpu as pltpu


def _round_up(x, m):
    return (x + m - 1) // m * m


def _double_conv_kernel(x_ref, w1_ref, b1_ref, w2_ref, b2_ref, mask_ref,
                        o_ref, h_ref, *, wp, p_pad, mx, mh):
    """One image per grid step.

    x_ref   : (Cin_p,  Px)        flat padded plane (margins folded into the rows)
    w1_ref  : (Cmid_p, 9*Cin_p)   folded conv1 weights, taps flattened into K
    b1_ref  : (Cmid_p, 1)         f32
    w2_ref  : (Cout_p, 9*Cmid_p)
    b2_ref  : (Cout_p, 1)         f32
    mask_ref: (1, P_pad)          1.0 on interior pixels of the padded plane
    o_ref   : (Cout_p, P_pad)     lane-dense output plane (border/tail discarded)
    h_ref   : (Cmid_p, 2*mh+P_pad) VMEM scratch for the intermediate activation
    """
    offs = [(dh - 1) * wp + (dw - 1) for dh in range(3) for dw in range(3)]
    cmid = h_ref.shape[0]

    # Zero only the two margin strips of the intermediate scratch; the interior
    # [mh, mh + p_pad) is fully overwritten below.  (Cheap: 2*mh lanes, vs. the
    # previous full-plane zeroing of Cmid_p * P stores per image.)
    h_ref[:, :mh] = jnp.zeros((cmid, mh), h_ref.dtype)
    h_ref[:, mh + p_pad: 2 * mh + p_pad] = jnp.zeros((cmid, mh), h_ref.dtype)

    # ---- conv1 (+ folded BN1) + ReLU: one K = 9*Cin matmul ------------------
    xs = jnp.concatenate(
        [x_ref[:, mx + o: mx + o + p_pad] for o in offs], axis=0)
    h = jnp.dot(w1_ref[...], xs, preferred_element_type=jnp.float32)
    h = jnp.maximum(h + b1_ref[...], 0.0) * mask_ref[...]
    h_ref[:, mh: mh + p_pad] = h.astype(h_ref.dtype)   # lane-aligned dense store

    # ---- conv2 (+ folded BN2) + ReLU: one K = 9*Cmid matmul -----------------
    hs = jnp.concatenate(
        [h_ref[:, mh + o: mh + o + p_pad] for o in offs], axis=0)
    out = jnp.dot(w2_ref[...], hs, preferred_element_type=jnp.float32)
    o_ref[...] = jnp.maximum(out + b2_ref[...], 0.0).astype(o_ref.dtype)


def _fold_bn(w, b, bn, eps=1e-5):
    """Fold eval-mode BatchNorm (gamma, beta, running_mean, running_var) into conv."""
    gamma, beta, mean, var = bn
    scale = gamma.astype(jnp.float32) / jnp.sqrt(var.astype(jnp.float32) + eps)
    w_f = w.astype(jnp.float32) * scale[:, None, None, None]
    b_f = (b.astype(jnp.float32) - mean.astype(jnp.float32)) * scale \
        + beta.astype(jnp.float32)
    return w_f, b_f


def _to_flat_taps(w_f, co_p, ci_p, dtype):
    """(Co, Ci, 3, 3) folded weights -> (Co_p, 9*Ci_p), column block k = dh*3+dw."""
    co, ci = w_f.shape[:2]
    w_f = jnp.pad(w_f, ((0, co_p - co), (0, ci_p - ci), (0, 0), (0, 0)))
    return jnp.transpose(w_f, (0, 2, 3, 1)).reshape(co_p, 9 * ci_p).astype(dtype)


def double_conv_pallas(x, w1, b1, bn1, w2, b2, bn2, *, eps=1e-5,
                       compute_dtype=jnp.bfloat16):
    """DoubleConv forward: Conv3x3(pad=1)+BN+ReLU, twice.  x: (N, Cin, H, W)."""
    N, Cin, H, W = x.shape
    Cmid = w1.shape[0]
    Cout = w2.shape[0]

    Wp, Hp = W + 2, H + 2
    P = Hp * Wp                               # flat padded-plane size
    P_pad = _round_up(P, 128)                 # lane-dense plane for stores/output
    mx = 2 * Wp                               # input margin: two extra zero rows on top
    mh = _round_up(Wp + 1, 128)               # lane-aligned margin for the VMEM scratch

    # Sublane-friendly channel padding (bf16 packs 2 rows per sublane).
    sub = 16 if jnp.dtype(compute_dtype).itemsize == 2 else 8
    Cin_p, Cmid_p, Cout_p = (_round_up(c, sub) for c in (Cin, Cmid, Cout))

    # Single padding pass over x: channel pad + zero ring + flat-lane margins are
    # all expressed as one jnp.pad in NCHW, then a free reshape onto lanes.
    need = mx + P_pad + Wp + 1                # one past the last lane any tap reads
    rows_total = -(-need // Wp)
    pad_top, pad_bot = 3, rows_total - (H + 3)   # 2 margin rows + 1 ring row on top
    Px = rows_total * Wp
    xm = jnp.pad(x.astype(compute_dtype),
                 ((0, 0), (0, Cin_p - Cin), (pad_top, pad_bot), (1, 1)))
    xm = xm.reshape(N, Cin_p, Px)

    # Fold eval-mode BN into the convs (f32) and flatten taps into K = 9*Cin.
    w1f, b1f = _fold_bn(w1, b1, bn1, eps)
    w2f, b2f = _fold_bn(w2, b2, bn2, eps)
    w1_t = _to_flat_taps(w1f, Cmid_p, Cin_p, compute_dtype)
    w2_t = _to_flat_taps(w2f, Cout_p, Cmid_p, compute_dtype)
    b1_c = jnp.pad(b1f, (0, Cmid_p - Cmid)).reshape(Cmid_p, 1)
    b2_c = jnp.pad(b2f, (0, Cout_p - Cout)).reshape(Cout_p, 1)

    # Interior mask on the lane-padded plane (zeros the ring + tail so conv2
    # sees correct zero padding).
    mask = jnp.zeros((Hp, Wp), jnp.float32).at[1:H + 1, 1:W + 1].set(1.0)
    mask = jnp.pad(mask.reshape(-1), (0, P_pad - P)).reshape(1, P_pad)

    kernel = functools.partial(_double_conv_kernel,
                               wp=Wp, p_pad=P_pad, mx=mx, mh=mh)

    # VMEM budget from the actual block / scratch / temporary sizes (+ headroom).
    itm = jnp.dtype(compute_dtype).itemsize
    out_it = jnp.dtype(x.dtype).itemsize
    blk_bytes = (Cin_p * Px * itm + Cout_p * P_pad * out_it
                 + (Cmid_p * 9 * Cin_p + Cout_p * 9 * Cmid_p) * itm
                 + (Cmid_p + Cout_p) * 4 + P_pad * 4)
    tmp_bytes = (9 * Cin_p + 9 * Cmid_p) * P_pad * itm \
        + (Cmid_p + Cout_p) * P_pad * 4
    scratch_bytes = Cmid_p * (2 * mh + P_pad) * itm
    vmem_limit = int(min(max(2 * blk_bytes + tmp_bytes + scratch_bytes + (8 << 20),
                             32 << 20), 100 << 20))

    flops = int(2 * N * P_pad * 9 * (Cin_p * Cmid_p + Cmid_p * Cout_p))
    bytes_accessed = int(N * Cin_p * Px * itm + N * Cout_p * P_pad * out_it
                         + (w1_t.size + w2_t.size) * itm
                         + (b1_c.size + b2_c.size + mask.size) * 4)

    y_flat = pl.pallas_call(
        kernel,
        out_shape=jax.ShapeDtypeStruct((N, Cout_p, P_pad), x.dtype),
        grid_spec=pltpu.PrefetchScalarGridSpec(
            num_scalar_prefetch=0,
            grid=(N,),
            in_specs=[
                pl.BlockSpec((None, Cin_p, Px), lambda n: (n, 0, 0)),      # x plane
                pl.BlockSpec((Cmid_p, 9 * Cin_p), lambda n: (0, 0)),       # w1 taps
                pl.BlockSpec((Cmid_p, 1), lambda n: (0, 0)),               # b1
                pl.BlockSpec((Cout_p, 9 * Cmid_p), lambda n: (0, 0)),      # w2 taps
                pl.BlockSpec((Cout_p, 1), lambda n: (0, 0)),               # b2
                pl.BlockSpec((1, P_pad), lambda n: (0, 0)),                # mask
            ],
            out_specs=pl.BlockSpec((None, Cout_p, P_pad), lambda n: (n, 0, 0)),
            scratch_shapes=[pltpu.VMEM((Cmid_p, 2 * mh + P_pad), compute_dtype)],
        ),
        compiler_params=pltpu.CompilerParams(
            dimension_semantics=("parallel",),
            vmem_limit_bytes=vmem_limit),
        cost_estimate=pl.CostEstimate(
            flops=flops, transcendentals=0, bytes_accessed=bytes_accessed),
    )(xm, w1_t, b1_c, w2_t, b2_c, mask)

    # Interior crop back to (N, Cout, H, W) (see TODO at top for fused consumers).
    y = y_flat[:, :Cout, :P].reshape(N, Cout, Hp, Wp)[:, :, 1:H + 1, 1:W + 1]
    return y


if __name__ == "__main__":
    N, Cin, Cout, H, W = 2, 4, 8, 16, 16
    Cmid = Cout                      # DoubleConv default: mid_channels = out_channels
    eps = 1e-5

    key = jax.random.PRNGKey(0)
    keys = jax.random.split(key, 5)

    x = jax.random.normal(keys[0], (N, Cin, H, W), dtype=jnp.float32)

    def conv_init(k, co, ci):
        fan_in = ci * 9
        bound = 1.0 / (fan_in ** 0.5)
        kw, kb = jax.random.split(k)
        w = jax.random.uniform(kw, (co, ci, 3, 3), jnp.float32, -bound, bound)
        b = jax.random.uniform(kb, (co,), jnp.float32, -bound, bound)
        return w, b

    def bn_init(k, c):
        k1, k2, k3, k4 = jax.random.split(k, 4)
        gamma = jax.random.uniform(k1, (c,), jnp.float32, 0.5, 1.5)
        beta = jax.random.uniform(k2, (c,), jnp.float32, -0.5, 0.5)
        mean = 0.1 * jax.random.normal(k3, (c,), jnp.float32)
        var = jax.random.uniform(k4, (c,), jnp.float32, 0.5, 1.5)
        return gamma, beta, mean, var

    w1, b1 = conv_init(keys[1], Cmid, Cin)
    w2, b2 = conv_init(keys[2], Cout, Cmid)
    bn1 = bn_init(keys[3], Cmid)
    bn2 = bn_init(keys[4], Cout)

    # Plain-JAX reference of eval-mode DoubleConv (conv -> BN -> ReLU, twice).
    def ref_layer(xi, w, b, bn):
        gamma, beta, mean, var = bn
        y = jax.lax.conv_general_dilated(
            xi, w, window_strides=(1, 1), padding=((1, 1), (1, 1)),
            dimension_numbers=("NCHW", "OIHW", "NCHW"),
            precision=jax.lax.Precision.HIGHEST)
        y = y + b[None, :, None, None]
        scale = gamma / jnp.sqrt(var + eps)
        y = (y - mean[None, :, None, None]) * scale[None, :, None, None] \
            + beta[None, :, None, None]
        return jnp.maximum(y, 0.0)

    ref = ref_layer(ref_layer(x, w1, b1, bn1), w2, b2, bn2)

    # Strict-accuracy path (f32 activations/weights).
    out_f32 = jax.jit(functools.partial(double_conv_pallas,
                                        compute_dtype=jnp.float32))(
        x, w1, b1, bn1, w2, b2, bn2)
    jax.block_until_ready(out_f32)
    assert out_f32.shape == (N, Cout, H, W)
    assert jnp.allclose(out_f32, ref, atol=1e-2, rtol=1e-2), \
        float(jnp.max(jnp.abs(out_f32 - ref)))

    # Default perf path: bf16 activations/weights, f32 MXU accumulation
    # (looser tolerance only reflects the bf16 quantization of inputs/weights).
    out = jax.jit(double_conv_pallas)(x, w1, b1, bn1, w2, b2, bn2)
    jax.block_until_ready(out)
    assert out.shape == (N, Cout, H, W)
    assert jnp.allclose(out, ref, atol=1e-1, rtol=1e-1), \
        float(jnp.max(jnp.abs(out - ref)))

    print("KERNEL_OK")
</pallas_src>

<mosaic_0001>
module attributes {stable_mosaic.version = 11 : i64} {
  func.func @_double_conv_kernel(%arg0: i32, %arg1: memref<1x8x450xf32, #tpu.memory_space<vmem>>, %arg2: memref<8x72xf32, #tpu.memory_space<vmem>>, %arg3: memref<8x1xf32, #tpu.memory_space<vmem>>, %arg4: memref<8x72xf32, #tpu.memory_space<vmem>>, %arg5: memref<8x1xf32, #tpu.memory_space<vmem>>, %arg6: memref<1x384xf32, #tpu.memory_space<vmem>>, %arg7: memref<1x8x384xf32, #tpu.memory_space<vmem>>, %arg8: memref<8x640xf32, #tpu.memory_space<vmem>>) attributes {dimension_semantics = [#tpu.dimension_semantics<parallel>], iteration_bounds = array<i64: 2>, scalar_prefetch = 0 : i64, scratch_operands = 1 : i64, tpu.core_type = #tpu.core_type<tc>, window_params = [{transform_indices = @transform_0, window_bounds = array<i64: 1, 8, 450>}, {pipeline_mode = #tpu.pipeline_mode<synchronous>, transform_indices = @transform_1, window_bounds = array<i64: 8, 72>}, {pipeline_mode = #tpu.pipeline_mode<synchronous>, transform_indices = @transform_2, window_bounds = array<i64: 8, 1>}, {pipeline_mode = #tpu.pipeline_mode<synchronous>, transform_indices = @transform_3, window_bounds = array<i64: 8, 72>}, {pipeline_mode = #tpu.pipeline_mode<synchronous>, transform_indices = @transform_4, window_bounds = array<i64: 8, 1>}, {pipeline_mode = #tpu.pipeline_mode<synchronous>, transform_indices = @transform_5, window_bounds = array<i64: 1, 384>}, {transform_indices = @transform_6, window_bounds = array<i64: 1, 8, 384>}]} {
    %cst = arith.constant 0.000000e+00 : f32
    %0 = vector.broadcast %cst : f32 to vector<8x128xf32>
    %c0 = arith.constant 0 : index
    %c0_0 = arith.constant 0 : index
    %1 = vector.load %arg8[%c0, %c0_0] : memref<8x640xf32, #tpu.memory_space<vmem>>, vector<8x128xf32>
    tpu.vector_store %arg8[%c0, %c0_0], %0 {strides = array<i32>} : memref<8x640xf32, #tpu.memory_space<vmem>>, vector<8x128xf32>,
    %cst_1 = arith.constant 0.000000e+00 : f32
    %2 = vector.broadcast %cst_1 : f32 to vector<8x128xf32>
    %c0_2 = arith.constant 0 : index
    %c512 = arith.constant 512 : index
    %3 = vector.load %arg8[%c0_2, %c512] : memref<8x640xf32, #tpu.memory_space<vmem>>, vector<8x128xf32>
    tpu.vector_store %arg8[%c0_2, %c512], %2 {strides = array<i32>} : memref<8x640xf32, #tpu.memory_space<vmem>>, vector<8x128xf32>,
    %c0_3 = arith.constant 0 : index
    %c0_4 = arith.constant 0 : index
    %c17 = arith.constant 17 : index
    %4 = vector.load %arg1[%c0_3, %c0_4, %c17] : memref<1x8x450xf32, #tpu.memory_space<vmem>>, vector<1x8x384xf32>
    %5 = vector.shape_cast %4 : vector<1x8x384xf32> to vector<8x384xf32>
    %c0_5 = arith.constant 0 : index
    %c0_6 = arith.constant 0 : index
    %c18 = arith.constant 18 : index
    %6 = vector.load %arg1[%c0_5, %c0_6, %c18] : memref<1x8x450xf32, #tpu.memory_space<vmem>>, vector<1x8x384xf32>
    %7 = vector.shape_cast %6 : vector<1x8x384xf32> to vector<8x384xf32>
    %c0_7 = arith.constant 0 : index
    %c0_8 = arith.constant 0 : index
    %c19 = arith.constant 19 : index
    %8 = vector.load %arg1[%c0_7, %c0_8, %c19] : memref<1x8x450xf32, #tpu.memory_space<vmem>>, vector<1x8x384xf32>
    %9 = vector.shape_cast %8 : vector<1x8x384xf32> to vector<8x384xf32>
    %c0_9 = arith.constant 0 : index
    %c0_10 = arith.constant 0 : index
    %c35 = arith.constant 35 : index
    %10 = vector.load %arg1[%c0_9, %c0_10, %c35] : memref<1x8x450xf32, #tpu.memory_space<vmem>>, vector<1x8x384xf32>
    %11 = vector.shape_cast %10 : vector<1x8x384xf32> to vector<8x384xf32>
    %c0_11 = arith.constant 0 : index
    %c0_12 = arith.constant 0 : index
    %c36 = arith.constant 36 : index
    %12 = vector.load %arg1[%c0_11, %c0_12, %c36] : memref<1x8x450xf32, #tpu.memory_space<vmem>>, vector<1x8x384xf32>
    %13 = vector.shape_cast %12 : vector<1x8x384xf32> to vector<8x384xf32>
    %c0_13 = arith.constant 0 : index
    %c0_14 = arith.constant 0 : index
    %c37 = arith.constant 37 : index
    %14 = vector.load %arg1[%c0_13, %c0_14, %c37] : memref<1x8x450xf32, #tpu.memory_space<vmem>>, vector<1x8x384xf32>
    %15 = vector.shape_cast %14 : vector<1x8x384xf32> to vector<8x384xf32>
    %c0_15 = arith.constant 0 : index
    %c0_16 = arith.constant 0 : index
    %c53 = arith.constant 53 : index
    %16 = vector.load %arg1[%c0_15, %c0_16, %c53] : memref<1x8x450xf32, #tpu.memory_space<vmem>>, vector<1x8x384xf32>
    %17 = vector.shape_cast %16 : vector<1x8x384xf32> to vector<8x384xf32>
    %c0_17 = arith.constant 0 : index
    %c0_18 = arith.constant 0 : index
    %c54 = arith.constant 54 : index
    %18 = vector.load %arg1[%c0_17, %c0_18, %c54] : memref<1x8x450xf32, #tpu.memory_space<vmem>>, vector<1x8x384xf32>
    %19 = vector.shape_cast %18 : vector<1x8x384xf32> to vector<8x384xf32>
    %c0_19 = arith.constant 0 : index
    %c0_20 = arith.constant 0 : index
    %c55 = arith.constant 55 : index
    %20 = vector.load %arg1[%c0_19, %c0_20, %c55] : memref<1x8x450xf32, #tpu.memory_space<vmem>>, vector<1x8x384xf32>
    %21 = vector.shape_cast %20 : vector<1x8x384xf32> to vector<8x384xf32>
    %22 = tpu.concatenate %5, %7, %9, %11, %13, %15, %17, %19, %21 in 0 : vector<8x384xf32>, vector<8x384xf32>, vector<8x384xf32>, vector<8x384xf32>, vector<8x384xf32>, vector<8x384xf32>, vector<8x384xf32>, vector<8x384xf32>, vector<8x384xf32> -> vector<72x384xf32>
    %c0_21 = arith.constant 0 : index
    %c0_22 = arith.constant 0 : index
    %23 = vector.load %arg2[%c0_21, %c0_22] : memref<8x72xf32, #tpu.memory_space<vmem>>, vector<8x72xf32>
    %cst_23 = arith.constant dense<0.000000e+00> : vector<8x384xf32>
    %24 = tpu.matmul %23, %22, %cst_23 {dimension_numbers = #tpu.dot_dimension_numbers<[1], [0], [0], [1], [0, 0, 1, 1], [], []>} : vector<8x72xf32>, vector<72x384xf32>, vector<8x384xf32> -> vector<8x384xf32>
    %c0_24 = arith.constant 0 : index
    %c0_25 = arith.constant 0 : index
    %25 = vector.load %arg3[%c0_24, %c0_25] : memref<8x1xf32, #tpu.memory_space<vmem>>, vector<8x1xf32>
    %26 = vector.broadcast %25 : vector<8x1xf32> to vector<8x384xf32>
    %27 = arith.addf %24, %26 : vector<8x384xf32>
    %cst_26 = arith.constant 0.000000e+00 : f32
    %28 = vector.broadcast %cst_26 : f32 to vector<8x384xf32>
    %29 = arith.maximumf %27, %28 : vector<8x384xf32>
    %c0_27 = arith.constant 0 : index
    %c0_28 = arith.constant 0 : index
    %30 = vector.load %arg6[%c0_27, %c0_28] : memref<1x384xf32, #tpu.memory_space<vmem>>, vector<1x384xf32>
    %31 = vector.broadcast %30 : vector<1x384xf32> to vector<8x384xf32>
    %32 = arith.mulf %29, %31 : vector<8x384xf32>
    %c0_29 = arith.constant 0 : index
    %c128 = arith.constant 128 : index
    %33 = vector.load %arg8[%c0_29, %c128] : memref<8x640xf32, #tpu.memory_space<vmem>>, vector<8x384xf32>
    tpu.vector_store %arg8[%c0_29, %c128], %32 {strides = array<i32>} : memref<8x640xf32, #tpu.memory_space<vmem>>, vector<8x384xf32>,
    %c0_30 = arith.constant 0 : index
    %c109 = arith.constant 109 : index
    %34 = vector.load %arg8[%c0_30, %c109] : memref<8x640xf32, #tpu.memory_space<vmem>>, vector<8x384xf32>
    %c0_31 = arith.constant 0 : index
    %c110 = arith.constant 110 : index
    %35 = vector.load %arg8[%c0_31, %c110] : memref<8x640xf32, #tpu.memory_space<vmem>>, vector<8x384xf32>
    %c0_32 = arith.constant 0 : index
    %c111 = arith.constant 111 : index
    %36 = vector.load %arg8[%c0_32, %c111] : memref<8x640xf32, #tpu.memory_space<vmem>>, vector<8x384xf32>
    %c0_33 = arith.constant 0 : index
    %c127 = arith.constant 127 : index
    %37 = vector.load %arg8[%c0_33, %c127] : memref<8x640xf32, #tpu.memory_space<vmem>>, vector<8x384xf32>
    %c0_34 = arith.constant 0 : index
    %c128_35 = arith.constant 128 : index
    %38 = vector.load %arg8[%c0_34, %c128_35] : memref<8x640xf32, #tpu.memory_space<vmem>>, vector<8x384xf32>
    %c0_36 = arith.constant 0 : index
    %c129 = arith.constant 129 : index
    %39 = vector.load %arg8[%c0_36, %c129] : memref<8x640xf32, #tpu.memory_space<vmem>>, vector<8x384xf32>
    %c0_37 = arith.constant 0 : index
    %c145 = arith.constant 145 : index
    %40 = vector.load %arg8[%c0_37, %c145] : memref<8x640xf32, #tpu.memory_space<vmem>>, vector<8x384xf32>
    %c0_38 = arith.constant 0 : index
    %c146 = arith.constant 146 : index
    %41 = vector.load %arg8[%c0_38, %c146] : memref<8x640xf32, #tpu.memory_space<vmem>>, vector<8x384xf32>
    %c0_39 = arith.constant 0 : index
    %c147 = arith.constant 147 : index
    %42 = vector.load %arg8[%c0_39, %c147] : memref<8x640xf32, #tpu.memory_space<vmem>>, vector<8x384xf32>
    %43 = tpu.concatenate %34, %35, %36, %37, %38, %39, %40, %41, %42 in 0 : vector<8x384xf32>, vector<8x384xf32>, vector<8x384xf32>, vector<8x384xf32>, vector<8x384xf32>, vector<8x384xf32>, vector<8x384xf32>, vector<8x384xf32>, vector<8x384xf32> -> vector<72x384xf32>
    %c0_40 = arith.constant 0 : index
    %c0_41 = arith.constant 0 : index
    %44 = vector.load %arg4[%c0_40, %c0_41] : memref<8x72xf32, #tpu.memory_space<vmem>>, vector<8x72xf32>
    %cst_42 = arith.constant dense<0.000000e+00> : vector<8x384xf32>
    %45 = tpu.matmul %44, %43, %cst_42 {dimension_numbers = #tpu.dot_dimension_numbers<[1], [0], [0], [1], [0, 0, 1, 1], [], []>} : vector<8x72xf32>, vector<72x384xf32>, vector<8x384xf32> -> vector<8x384xf32>
    %c0_43 = arith.constant 0 : index
    %c0_44 = arith.constant 0 : index
    %46 = vector.load %arg5[%c0_43, %c0_44] : memref<8x1xf32, #tpu.memory_space<vmem>>, vector<8x1xf32>
    %47 = vector.broadcast %46 : vector<8x1xf32> to vector<8x384xf32>
    %48 = arith.addf %45, %47 : vector<8x384xf32>
    %cst_45 = arith.constant 0.000000e+00 : f32
    %49 = vector.broadcast %cst_45 : f32 to vector<8x384xf32>
    %50 = arith.maximumf %48, %49 : vector<8x384xf32>
    %c0_46 = arith.constant 0 : index
    %c0_47 = arith.constant 0 : index
    %c0_48 = arith.constant 0 : index
    %51 = vector.load %arg7[%c0_46, %c0_47, %c0_48] : memref<1x8x384xf32, #tpu.memory_space<vmem>>, vector<1x8x384xf32>
    %52 = vector.shape_cast %51 : vector<1x8x384xf32> to vector<8x384xf32>
    %53 = vector.shape_cast %50 : vector<8x384xf32> to vector<1x8x384xf32>
    tpu.vector_store %arg7[%c0_46, %c0_47, %c0_48], %53 {strides = array<i32>} : memref<1x8x384xf32, #tpu.memory_space<vmem>>, vector<1x8x384xf32>,
    return
  }
  func.func @transform_0(%arg0: i32) -> (i32, i32, i32) {
    %c0_i32 = arith.constant 0 : i32
    %c0_i32_0 = arith.constant 0 : i32
    %c0_i32_1 = arith.constant 0 : i32
    return %arg0, %c0_i32, %c0_i32_0 : i32, i32, i32
  }
  func.func @transform_1(%arg0: i32) -> (i32, i32) {
    %c0_i32 = arith.constant 0 : i32
    %c0_i32_0 = arith.constant 0 : i32
    %c0_i32_1 = arith.constant 0 : i32
    return %c0_i32, %c0_i32_0 : i32, i32
  }
  func.func @transform_2(%arg0: i32) -> (i32, i32) {
    %c0_i32 = arith.constant 0 : i32
    %c0_i32_0 = arith.constant 0 : i32
    %c0_i32_1 = arith.constant 0 : i32
    return %c0_i32, %c0_i32_0 : i32, i32
  }
  func.func @transform_3(%arg0: i32) -> (i32, i32) {
    %c0_i32 = arith.constant 0 : i32
    %c0_i32_0 = arith.constant 0 : i32
    %c0_i32_1 = arith.constant 0 : i32
    return %c0_i32, %c0_i32_0 : i32, i32
  }
  func.func @transform_4(%arg0: i32) -> (i32, i32) {
    %c0_i32 = arith.constant 0 : i32
    %c0_i32_0 = arith.constant 0 : i32
    %c0_i32_1 = arith.constant 0 : i32
    return %c0_i32, %c0_i32_0 : i32, i32
  }
  func.func @transform_5(%arg0: i32) -> (i32, i32) {
    %c0_i32 = arith.constant 0 : i32
    %c0_i32_0 = arith.constant 0 : i32
    %c0_i32_1 = arith.constant 0 : i32
    return %c0_i32, %c0_i32_0 : i32, i32
  }
  func.func @transform_6(%arg0: i32) -> (i32, i32, i32) {
    %c0_i32 = arith.constant 0 : i32
    %c0_i32_0 = arith.constant 0 : i32
    %c0_i32_1 = arith.constant 0 : i32
    return %arg0, %c0_i32, %c0_i32_0 : i32, i32, i32
  }
}

</mosaic_0001>

<bundles_post_ra>
// kernel: double_conv_pallas.1
= control target key start
LH: loop header
LB: loop body
LE: loop exit
PB: predicated region body
PF: predicated region fallthrough
CT: control target
= control target key end

     0   :  { %s1612_s21 = smov 0   ;;  %s1940_s0 = inlined_call_operand.vmem [shape: f32[2,8,450], index: 0, kind: input, shape index: {}]   ;;  %s1941_s1 = inlined_call_operand.vmem [shape: f32[8,72], index: 1, kind: input, shape index: {}]   ;;  %s1942_s2 = inlined_call_operand.vmem [shape: f32[8,1], index: 2, kind: input, shape index: {}]   ;;  %s1943_s3 = inlined_call_operand.vmem [shape: f32[8,72], index: 3, kind: input, shape index: {}]   ;;  %s1944_s4 = inlined_call_operand.vmem [shape: f32[8,1], index: 4, kind: input, shape index: {}]   ;;  %s1945_s5 = inlined_call_operand.vmem [shape: f32[1,384], index: 5, kind: input, shape index: {}]   ;;  %s1946_s6 = inlined_call_operand.vmem [shape: f32[2,8,384], index: 6, kind: output, shape index: {}]  }
   0x1 LB: > { %s1103_s22 = sadd.s32 4294967295, %s1561_s21   ;;  %p1107_p0 = scmp.ge.s32.totalorder %s1561_s21, 1  ;;  %s1561_s21 = sphi %s1612_s21, %s16_s21  }
   0x2   : > { %p212_p1 = scmp.lt.s32.totalorder %s1561_s21, 3 }
   0x4   : > { %p213_p2 = pnand %p1107_p0, %p212_p1 }
   0x5   : > { %p242_p3 = scmp.lt.s32.totalorder (!%p213_p2), %s1103_s22, 1  ;;  %s1563_s27 = smov (!%p213_p2), 126   ;;  %vm270_vm0 = vcmask (!%p213_p2), 1039360   ;;  %vm282_vm1 = vcmask (!%p213_p2), 1031168   ;;  %vm294_vm2 = vcmask (!%p213_p2), 900096   ;;  %vm306_vm3 = vcmask (!%p213_p2), 891904  }
   0x6   : > { %216 = sbr.rel (%p213_p2) target bundleno = 1031 (0x407), region = 44  ;;  %s1564_s28 = smov (!%p213_p2), 127   ;;  %vm318_vm4 = vcmask (!%p213_p2), 883712   ;;  %vm330_vm5 = vcmask (!%p213_p2), 752640   ;;  %v1572_v59 = vmov (!%p213_p2), 0.0|0.0   ;;  %vm342_vm6 = vcmask (!%p213_p2), 744448  }
   0x7   : > { %s1565_s29 = smov (!%p213_p2), 110   ;;  %s1566_s30 = smov (!%p213_p2), 109   ;;  %1196 = vmatprep.subr.bf16.mxu1 (!%p213_p2), %v1572_v59  ;;  %vm354_vm7 = vcmask (!%p213_p2), 736256   ;;  %vm1574_vm8 = vmmov (!%p213_p2), 0   ;;  %vm437_vm9 = vcmask (!%p213_p2), 908288   ;;  %vm492_vm10 = vcmask (!%p213_p2), 588800  }
   0x8   : > { %s1567_s7 = smov (!%p213_p2), 108   ;;  %s1568_s8 = smov (!%p213_p2), 92   ;;  %vm843_vm11 = vcmask (!%p213_p2), 154624  }
   0x9   : > { %s1569_s9 = smov (!%p213_p2), 91   ;;  %s1570_s10 = smov (!%p213_p2), 90  }
   0xa   : > { %s1571_s11 = smov (!%p213_p2), 111   ;;  %s1576_s18 = smov (!%p213_p2), 19  }
   0xd   : > { %s1948_s22 = smov (!%p242_p3, %s1103_s22), 1 }
   0xe   : > { %s1117_s23 = sshll.u32 %s1948_s22, 5  ;;  %s1236_s25 = smul.u32 24, %s1948_s22 }
   0xf   : > { %s246_s26 = scalar_lea.vmem %s1940_s0, %s1117_s23 }
  0x10   : > { %v255_v0 = vld [vmem:[%s246_s26 + $0x8] sm:$0xff]  ;;  %v256_v1 = vld [vmem:[%s246_s26 + $0x10] sm:$0xff]  ;;  %v254_v2 = vld [vmem:[%s246_s26] sm:$0xff] }
  0x11   : > { %v1269_v3 = vpack.i.bf16 %v256_v1, %v255_v0  ;;  %v257_v4 = vld [vmem:[%s246_s26 + $0x18] sm:$0xff] }
  0x12   : > { %v1274_v5 = vpack.i.bf16 %v254_v2, %v257_v4 }
  0x13   : > { %1270 = vrot.lane.b32.xlu1 %v1269_v3, %s1563_s27  ;;  %1260 = vrot.lane.b32.xlu0 %v1269_v3, %s1564_s28 }
  0x17   : > { %1275 = vrot.lane.b32.xlu1 %v1274_v5, %s1563_s27  ;;  %1265 = vrot.lane.b32.xlu0 %v1274_v5, %s1564_s28 }
  0x1b   : > { %1285 = vrot.lane.b32.xlu1 %v1274_v5, %s1565_s29  ;;  %1280 = vrot.lane.b32.xlu0 %v1269_v3, %s1565_s29 }
  0x1f   : > { %1295 = vrot.lane.b32.xlu1 %v1274_v5, %s1566_s30  ;;  %1290 = vrot.lane.b32.xlu0 %v1269_v3, %s1566_s30 }
  0x23   : > { %1305 = vrot.lane.b32.xlu1 %v1274_v5, %s1567_s7  ;;  %1300 = vrot.lane.b32.xlu0 %v1269_v3, %s1567_s7 }
  0x27   : > { %1315 = vrot.lane.b32.xlu1 %v1274_v5, %s1568_s8  ;;  %1310 = vrot.lane.b32.xlu0 %v1269_v3, %s1568_s8 }
  0x2b   : > { %1325 = vrot.lane.b32.xlu1 %v1274_v5, %s1569_s9  ;;  %1320 = vrot.lane.b32.xlu0 %v1269_v3, %s1569_s9 }
  0x2f   : > { %350 = vrot.lane.b32.xlu1 %v256_v1, %s1570_s10  ;;  %348 = vrot.lane.b32.xlu0 %v255_v0, %s1570_s10 }
  0x33   : > { %346 = vrot.lane.b32.xlu1 %v254_v2, %s1570_s10  ;;  %352 = vrot.lane.b32.xlu0 %v257_v4, %s1570_s10 }
  0x37   : > { %1330 = vrot.lane.b32.xlu0 %v1269_v3, %s1571_s11 }
  0x85   : > { %v1271_v6 = vpop.permute.xlu1 %1270  ;;  %v1645_v7 = vpop.permute.xlu0 %1260 }
  0x86   : > { %v1262_v8 = vunpack.i.l.bf16 %v1645_v7  ;;  %v1273_v14 = vunpack.i.h.bf16 %v1271_v6  ;;  %v1272_v15 = vunpack.i.l.bf16 %v1271_v6  ;;  %v1263_v54 = vunpack.i.h.bf16 %v1645_v7 }
  0x88   : > { %v284_v27 = vsel %vm282_vm1, %v1272_v15, %v1273_v14 }
  0x89   : > { %v1276_v9 = vpop.permute.xlu1 %1275  ;;  %v1648_v10 = vpop.permute.xlu0 %1265 }
  0x8a   : > { %v1277_v11 = vunpack.i.l.bf16 %v1276_v9  ;;  %v1268_v12 = vunpack.i.h.bf16 %v1648_v10  ;;  %v1267_v13 = vunpack.i.l.bf16 %v1648_v10  ;;  %v1278_v25 = vunpack.i.h.bf16 %v1276_v9 }
  0x8c   : > { %v1334_v16 = vpack.i.bf16 %v1267_v13, %v257_v4  ;;  %v271_v17 = vsel %vm270_vm0, %v1268_v12, %v1262_v8  ;;  %v285_v24 = vsel %vm282_vm1, %v1273_v14, %v1277_v11  ;;  %v283_v35 = vsel %vm282_vm1, %v1278_v25, %v1272_v15 }
  0x8d   : > { %v1657_v18 = vpop.permute.xlu1 %1285  ;;  %v1659_v19 = vpop.permute.xlu0 %1280  ;;  %v1359_v20 = vpack.i.bf16 %v271_v17, %v254_v2  ;;  %v1364_v30 = vpack.i.bf16 %v285_v24, %v284_v27  ;;  %v272_v4 = vsel %vm270_vm0, %v1262_v8, %v1263_v54  ;;  %v273_v5 = vsel %vm270_vm0, %v1263_v54, %v1267_v13 }
  0x8e   : > { %v1288_v21 = vunpack.i.h.bf16 %v1657_v18  ;;  %v1287_v22 = vunpack.i.l.bf16 %v1657_v18  ;;  %v1282_v23 = vunpack.i.l.bf16 %v1659_v19  ;;  %1335 = vrot.lane.b32.xlu1 %v1334_v16, %s1571_s11  ;;  %v1283_v2 = vunpack.i.h.bf16 %v1659_v19 }
  0x8f   : > { %1360 = vrot.lane.b32.xlu0 %v1359_v20, %s1571_s11  ;;  %v1573_v25 = vmov 0.0  }
  0x90   : > { %v1339_v26 = vpack.i.bf16 %v1287_v22, %v1277_v11  ;;  %v295_v34 = vsel %vm294_vm2, %v1288_v21, %v1282_v23  ;;  %v1354_v11 = vpack.i.bf16 %v273_v5, %v272_v4  ;;  %v296_v7 = vsel %vm294_vm2, %v1282_v23, %v1283_v2  ;;  %560 = vmatprep.mubr.f32.mxu0 %v1573_v25 }
  0x91   : > { %v1296_v28 = vpop.permute.xlu1 %1295  ;;  %v1291_v29 = vpop.permute.xlu0 %1290  ;;  %v1374_v38 = vpack.i.bf16 %v295_v34, %v283_v35  ;;  %v297_v8 = vsel %vm294_vm2, %v1283_v2, %v1287_v22  ;;  %1156 = vmatprep.mubr.msk.f32.mxu1 %vm1574_vm8, %v1573_v25 }
  0x92   : > { %v1297_v31 = vunpack.i.l.bf16 %v1296_v28  ;;  %v1293_v32 = vunpack.i.h.bf16 %v1291_v29  ;;  %v1292_v33 = vunpack.i.l.bf16 %v1291_v29  ;;  %1340 = vrot.lane.b32.xlu1 %v1339_v26, %s1571_s11  ;;  %v1298_v44 = vunpack.i.h.bf16 %v1296_v28  ;;  %v359_v28 = vld [vmem:[%s1942_s2] sm:$0xff] }
  0x93   : > { %1365 = vrot.lane.b32.xlu0 %v1364_v30, %s1571_s11  ;;  %v1369_v13 = vpack.i.bf16 %v297_v8, %v296_v7  ;;  %v1575_v29 = vmov 0  }
  0x94   : > { %v308_v39 = vsel %vm306_vm3, %v1292_v33, %v1293_v32  ;;  %v309_v43 = vsel %vm306_vm3, %v1293_v32, %v1297_v31  ;;  %v307_v53 = vsel %vm306_vm3, %v1298_v44, %v1292_v33  ;;  %1409 = vset.pattern.permute.xlu0 %v1575_v29 }
  0x95   : > { %v1306_v36 = vpop.permute.xlu1 %1305  ;;  %v1301_v37 = vpop.permute.xlu0 %1300  ;;  %v1379_v48 = vpack.i.bf16 %v309_v43, %v308_v39 }
  0x96   : > { %v1308_v40 = vunpack.i.h.bf16 %v1306_v36  ;;  %v1307_v41 = vunpack.i.l.bf16 %v1306_v36  ;;  %v1302_v42 = vunpack.i.l.bf16 %v1301_v37  ;;  %v1303_v14 = vunpack.i.h.bf16 %v1301_v37 }
  0x97   : > { %1375 = vrot.lane.b32.xlu0 %v1374_v38, %s1571_s11 }
  0x98   : > { %v1344_v45 = vpack.i.bf16 %v1307_v41, %v1297_v31  ;;  %v319_v52 = vsel %vm318_vm4, %v1308_v40, %v1302_v42  ;;  %v320_v20 = vsel %vm318_vm4, %v1302_v42, %v1303_v14  ;;  %v321_v21 = vsel %vm318_vm4, %v1303_v14, %v1307_v41 }
  0x99   : > { %v1316_v46 = vpop.permute.xlu1 %1315  ;;  %v1311_v47 = vpop.permute.xlu0 %1310  ;;  %v1389_v57 = vpack.i.bf16 %v319_v52, %v307_v53  ;;  %v1384_v18 = vpack.i.bf16 %v321_v21, %v320_v20 }
  0x9a   : > { %v1317_v49 = vunpack.i.l.bf16 %v1316_v46  ;;  %v1313_v50 = vunpack.i.h.bf16 %v1311_v47  ;;  %v1312_v51 = vunpack.i.l.bf16 %v1311_v47  ;;  %1345 = vrot.lane.b32.xlu1 %v1344_v45, %s1571_s11  ;;  %v1318_v0 = vunpack.i.h.bf16 %v1316_v46 }
  0x9b   : > { %1380 = vrot.lane.b32.xlu0 %v1379_v48, %s1571_s11 }
  0x9c   : > { %v332_v58 = vsel %vm330_vm5, %v1312_v51, %v1313_v50  ;;  %v333_v63 = vsel %vm330_vm5, %v1313_v50, %v1317_v49  ;;  %v331_v12 = vsel %vm330_vm5, %v1318_v0, %v1312_v51 }
  0x9d   : > { %v1326_v55 = vpop.permute.xlu1 %1325  ;;  %v1321_v56 = vpop.permute.xlu0 %1320  ;;  %v1394_v3 = vpack.i.bf16 %v333_v63, %v332_v58 }
  0x9e   : > { %v1328_v60 = vunpack.i.h.bf16 %v1326_v55  ;;  %v1327_v61 = vunpack.i.l.bf16 %v1326_v55  ;;  %v1322_v62 = vunpack.i.l.bf16 %v1321_v56  ;;  %v1323_v17 = vunpack.i.h.bf16 %v1321_v56 }
  0x9f   : > { %1390 = vrot.lane.b32.xlu0 %v1389_v57, %s1571_s11 }
  0xa0   : > { %v1349_v1 = vpack.i.bf16 %v1327_v61, %v1317_v49  ;;  %v343_v6 = vsel %vm342_vm6, %v1328_v60, %v1322_v62  ;;  %v344_v23 = vsel %vm342_vm6, %v1322_v62, %v1323_v17  ;;  %v345_v24 = vsel %vm342_vm6, %v1323_v17, %v1327_v61 }
  0xa1   : > { %v351_v9 = vpop.permute.xlu1 %350  ;;  %v1404_v15 = vpack.i.bf16 %v343_v6, %v331_v12  ;;  %v349_v10 = vpop.permute.xlu0 %348  ;;  %v1399_v26 = vpack.i.bf16 %v345_v24, %v344_v23 }
  0xa2   : > { %1350 = vrot.lane.b32.xlu1 %v1349_v1, %s1571_s11  ;;  %v356_v16 = vsel %vm354_vm7, %v349_v10, %v351_v9 }
  0xa3   : > { %1395 = vrot.lane.b32.xlu0 %v1394_v3, %s1571_s11 }
  0xa5   : > { %v347_v19 = vpop.permute.xlu1 %346  ;;  %v353_v27 = vpop.permute.xlu0 %352 }
  0xa6   : > { %1355 = vrot.lane.b32.xlu1 %v1354_v11, %s1571_s11  ;;  %v355_v22 = vsel %vm354_vm7, %v347_v19, %v349_v10  ;;  %v357_v30 = vsel %vm354_vm7, %v351_v9, %v353_v27 }
  0xa7   : > { %1405 = vrot.lane.b32.xlu0 %v1404_v15, %s1571_s11 }
  0xa9   : > { %v1331_v31 = vpop.permute.xlu0 %1330 }
  0xaa   : > { %1370 = vrot.lane.b32.xlu1 %v1369_v13, %s1571_s11  ;;  %v1333_v40 = vunpack.i.h.bf16 %v1331_v31  ;;  %v1332_v43 = vunpack.i.l.bf16 %v1331_v31 }
  0xab   : > { %431 = vrot.lane.b32.xlu0 %v356_v16, %s1571_s11 }
  0xac   : > { %v439_v50 = vsel %vm437_vm9, %v1332_v43, %v1333_v40 }
  0xae   : > { %1385 = vrot.lane.b32.xlu1 %v1384_v18, %s1571_s11 }
  0xaf   : > { %429 = vrot.lane.b32.xlu0 %v355_v22, %s1571_s11 }
  0xb2   : > { %1400 = vrot.lane.b32.xlu1 %v1399_v26, %s1571_s11 }
  0xb3   : > { %362 = vperm.xlu0 %1409, %v359_v28  }
  0xb6   : > { %433 = vrot.lane.b32.xlu1 %v357_v30, %s1571_s11 }
  0xba   : > { %435 = vrot.lane.b32.xlu1 %v353_v27, %s1571_s11 }
 0x100   : > { %v1336_v34 = vpop.permute.xlu1 %1335 }
 0x101   : > { %v1361_v32 = vpop.permute.xlu0 %1360  ;;  %v1337_v41 = vunpack.i.l.bf16 %v1336_v34  ;;  %v1338_v47 = vunpack.i.h.bf16 %v1336_v34 }
 0x102   : > { %v1362_v44 = vunpack.i.l.bf16 %v1361_v32  ;;  %v1363_v48 = vunpack.i.h.bf16 %v1361_v32 }
 0x103   : > { %v440_v51 = vsel %vm437_vm9, %v1333_v40, %v1337_v41 }
 0x104   : > { %v1341_v36 = vpop.permute.xlu1 %1340  ;;  %v438_v56 = vsel %vm437_vm9, %v1362_v44, %v1332_v43 }
 0x105   : > { %v1366_v33 = vpop.permute.xlu0 %1365  ;;  %v1343_v52 = vunpack.i.h.bf16 %v1341_v36  ;;  %v1342_v57 = vunpack.i.l.bf16 %v1341_v36 }
 0x106   : > { %v1368_v45 = vunpack.i.h.bf16 %v1366_v33  ;;  %v1367_v46 = vunpack.i.l.bf16 %v1366_v33 }
 0x108   : > { %v445_v1 = vsel %vm437_vm9, %v1367_v46, %v1368_v45  ;;  %v446_v15 = vsel %vm437_vm9, %v1368_v45, %v1342_v57 }
 0x109   : > { %v1376_v35 = vpop.permute.xlu0 %1375 }
 0x10a   : > { %v1377_v58 = vunpack.i.l.bf16 %v1376_v35  ;;  %v1378_v9 = vunpack.i.h.bf16 %v1376_v35 }
 0x10c   : > { %v1727_v38 = vpop.permute.xlu1 %1345  ;;  %v444_v7 = vsel %vm437_vm9, %v1377_v58, %v1367_v46  ;;  %v358_v58 = vld [vmem:[%s1941_s1] sm:$0xff] }
 0x10d   : > { %v1381_v37 = vpop.permute.xlu0 %1380  ;;  %v1347_v2 = vunpack.i.l.bf16 %v1727_v38  ;;  %v1348_v10 = vunpack.i.h.bf16 %v1727_v38 }
 0x10e   : > { %v1383_v60 = vunpack.i.h.bf16 %v1381_v37  ;;  %v1382_v61 = vunpack.i.l.bf16 %v1381_v37 }
 0x110   : > { %v451_v8 = vsel %vm437_vm9, %v1382_v61, %v1383_v60  ;;  %v452_v23 = vsel %vm437_vm9, %v1383_v60, %v1347_v2  ;;  %v640_v2 = vld [vmem:[%s1945_s5] sm:$0x7] }
 0x111   : > { %v1729_v39 = vpop.permute.xlu0 %1390 }
 0x112   : > { %v1392_v11 = vunpack.i.l.bf16 %v1729_v39  ;;  %v1393_v24 = vunpack.i.h.bf16 %v1729_v39 }
 0x114   : > { %v1731_v42 = vpop.permute.xlu1 %1350  ;;  %v450_v28 = vsel %vm437_vm9, %v1392_v11, %v1382_v61 }
 0x115   : > { %v1735_v53 = vpop.permute.xlu0 %1395  ;;  %v1352_v29 = vunpack.i.l.bf16 %v1731_v42  ;;  %v1353_v40 = vunpack.i.h.bf16 %v1731_v42 }
 0x116   : > { %v1398_v30 = vunpack.i.h.bf16 %v1735_v53  ;;  %v1397_v31 = vunpack.i.l.bf16 %v1735_v53 }
 0x118   : > { %v1356_v49 = vpop.permute.xlu1 %1355  ;;  %v457_v46 = vsel %vm437_vm9, %v1397_v31, %v1398_v30 }
 0x119   : > { %v1358_v54 = vunpack.i.h.bf16 %v1356_v49  ;;  %v1357_v55 = vunpack.i.l.bf16 %v1356_v49  ;;  %v1406_v13 = vpop.permute.xlu0 %1405 }
 0x11a   : > { %v1407_v32 = vunpack.i.l.bf16 %v1406_v13  ;;  %v1408_v41 = vunpack.i.h.bf16 %v1406_v13 }
 0x11b   : > { %v442_v62 = vsel %vm437_vm9, %v1357_v55, %v1358_v54  ;;  %v443_v63 = vsel %vm437_vm9, %v1358_v54, %v1338_v47  ;;  %v441_v0 = vsel %vm437_vm9, %v1363_v48, %v1357_v55  ;;  %v458_v47 = vsel %vm437_vm9, %v1398_v30, %v1352_v29 }
 0x11c   : > { %v1371_v3 = vpop.permute.xlu1 %1370  ;;  %v1180_v4 = vpack.c.bf16 %v442_v62, %v439_v50  ;;  %v1197_v5 = vpack.c.bf16 %v443_v63, %v440_v51  ;;  %v1182_v6 = vpack.c.bf16 %v441_v0, %v438_v56  ;;  %v456_v48 = vsel %vm437_vm9, %v1407_v32, %v1397_v31 }
 0x11d   : > { %v1373_v12 = vunpack.i.h.bf16 %v1371_v3  ;;  %v1372_v14 = vunpack.i.l.bf16 %v1371_v3  ;;  %v432_v43 = vpop.permute.xlu0 %431  ;;  %v642_v62 = vlaneseq }
 0x11e   : > { %1181 = vmatprep.subr.bf16.mxu0 %v1180_v4  ;;  %1198 = vmatpush3.bf16.msra.mxu1 %v1197_v5 }
 0x11f   : > { %1183 = vmatpush1.bf16.msra.mxu0 %v1182_v6  ;;  %1199 = vmatprep.subr.bf16.mxu1 %v1572_v59  ;;  %v448_v16 = vsel %vm437_vm9, %v1372_v14, %v1373_v12  ;;  %v449_v17 = vsel %vm437_vm9, %v1373_v12, %v1343_v52  ;;  %v447_v20 = vsel %vm437_vm9, %v1378_v9, %v1372_v14  ;;  %v643_v63 = vshrl.u32 %v642_v62, 7 }
 0x120   : > { %v1386_v21 = vpop.permute.xlu1 %1385  ;;  %v1184_v19 = vpack.c.bf16 %v448_v16, %v445_v1  ;;  %v1200_v18 = vpack.c.bf16 %v449_v17, %v446_v15  ;;  %v1186_v22 = vpack.c.bf16 %v447_v20, %v444_v7 }
 0x121   : > { %v1388_v26 = vunpack.i.h.bf16 %v1386_v21  ;;  %v1387_v27 = vunpack.i.l.bf16 %v1386_v21  ;;  %v430_v55 = vpop.permute.xlu0 %429  ;;  %v652_v0 = vsub.s32 2, %v643_v63  ;;  %v644_v3 = vsub.s32 0, %v643_v63 }
 0x122   : > { %1185 = vmatprep.subr.bf16.mxu0 %v1184_v19  ;;  %1201 = vmatpush3.bf16.msra.mxu1 %v1200_v18  ;;  %v462_v61 = vsel %vm437_vm9, %v430_v55, %v432_v43  ;;  %v648_v4 = vsub.s32 1, %v643_v63 }
 0x123   : > { %1187 = vmatpush1.bf16.msra.mxu0 %v1186_v22  ;;  %1202 = vmatprep.subr.bf16.mxu1 %v1572_v59  ;;  %v454_v33 = vsel %vm437_vm9, %v1387_v27, %v1388_v26  ;;  %v455_v34 = vsel %vm437_vm9, %v1388_v26, %v1348_v10  ;;  %v453_v35 = vsel %vm437_vm9, %v1393_v24, %v1387_v27 }
 0x124   : > { %v1401_v36 = vpop.permute.xlu1 %1400  ;;  %v1188_v37 = vpack.c.bf16 %v454_v33, %v451_v8  ;;  %v1203_v38 = vpack.c.bf16 %v455_v34, %v452_v23  ;;  %v1190_v39 = vpack.c.bf16 %v453_v35, %v450_v28  ;;  %v653_v9 = vrot.slane %v640_v2, %v652_v0 }
 0x125   : > { %v1403_v44 = vunpack.i.h.bf16 %v1401_v36  ;;  %v1402_v45 = vunpack.i.l.bf16 %v1401_v36  ;;  %v645_v15 = vrot.slane %v640_v2, %v644_v3  ;;  %v649_v13 = vrot.slane %v640_v2, %v648_v4 }
 0x126   : > { %1189 = vmatprep.subr.bf16.mxu0 %v1188_v37  ;;  %1204 = vmatpush3.bf16.msra.mxu1 %v1203_v38 }
 0x127   : > { %1191 = vmatpush1.bf16.msra.mxu0 %v1190_v39  ;;  %1205 = vmatprep.subr.bf16.mxu1 %v1572_v59  ;;  %v460_v49 = vsel %vm437_vm9, %v1402_v45, %v1403_v44  ;;  %v461_v50 = vsel %vm437_vm9, %v1403_v44, %v1353_v40  ;;  %v459_v42 = vsel %vm437_vm9, %v1408_v41, %v1402_v45 }
 0x128   : > { %v434_v51 = vpop.permute.xlu1 %433  ;;  %v1192_v52 = vpack.c.bf16 %v460_v49, %v457_v46  ;;  %v1206_v53 = vpack.c.bf16 %v461_v50, %v458_v47  ;;  %v1194_v54 = vpack.c.bf16 %v459_v42, %v456_v48 }
 0x129   : > { %v463_v56 = vsel %vm437_vm9, %v432_v43, %v434_v51 }
 0x12a   : > { %1193 = vmatprep.subr.bf16.mxu0 %v1192_v52  ;;  %1207 = vmatpush3.bf16.msra.mxu1 %v1206_v53 }
 0x12b   : > { %1195 = vmatpush1.bf16.msra.mxu0 %v1194_v54  ;;  %1154 = vmatprep.subr.mxu1 %v1573_v25 }
 0x12c   : > { %v436_v57 = vpop.permute.xlu1 %435  ;;  %512 = vmatprep.subr.mxu0 %v463_v56 }
 0x12d   : > { %v464_v60 = vsel %vm437_vm9, %v434_v51, %v436_v57 }
 0x12e   : > { %1155 = vmatpush3.msra.mxu1 %v464_v60 }
 0x12f   : > { %513 = vmatpush1.msra.mxu0 %v462_v61  ;;  %1157 = vmatmul.mubr.msk.f32.vlgmr.msra.gmra.mrb[0].mxu1 %vm492_vm10, %v358_v58 }
 0x130   : > { %1111 = vmatmul.mubr.msk.f32.vlgmr.msra.gmra.mrb[0].mxu0 %vm492_vm10, %v358_v58  ;;  %1224 = vmatprep.subr.bf16.mxu1 %v1572_v59 }
 0x131   : > { %1177 = vmatprep.mubr.msk.f32.mxu1 %vm1574_vm8, %v1573_v25  ;;  %965 = vmatprep.mubr.f32.mxu0 %v1573_v25 }
 0x132   : > { %v363_v1 = vpop.permute.xlu0 %362 }
 0x202   : > { %v633_v5 = vpop.f32.mrb[0].mxu1 }
 0x203   : > { %v634_v6 = vadd.f32 %v633_v5, %v363_v1  ;;  %v562_v11 = vpop.f32.mrb[0].mxu0  ;;  %v1158_v12 = vpop.f32.mrb[1].mxu1 }
 0x204   : > { %v563_v14 = vadd.f32 %v562_v11, %v363_v1  ;;  %v564_v7 = vpop.f32.mrb[1].mxu0 }
 0x205   : > { %v639_v8 = vmax.f32 %v634_v6, 0.0  ;;  %v565_v10 = vadd.f32 %v564_v7, %v363_v1 }
 0x206   : > { %v637_v16 = vmax.f32 %v563_v14, 0.0 }
 0x207   : > { %v659_v17 = vmul.f32 %v653_v9, %v639_v8  ;;  %v638_v20 = vmax.f32 %v565_v10, 0.0 }
 0x208   : > { %v657_v21 = vmul.f32 %v645_v15, %v637_v16 }
 0x209   : > { %v658_v19 = vmul.f32 %v649_v13, %v638_v20  ;;  %v1410_v18 = vpack.i.bf16 %v1573_v25, %v659_v17 }
 0x20b   : > { %1411 = vrot.lane.b32.xlu1 %v1410_v18, %s1564_s28  ;;  %v1445_v22 = vpack.i.bf16 %v658_v19, %v657_v21 }
 0x20d   : > { %1446 = vrot.lane.b32.xlu0 %v1445_v22, %s1563_s27 }
 0x20f   : > { %1416 = vrot.lane.b32.xlu1 %v1410_v18, %s1563_s27 }
 0x211   : > { %1451 = vrot.lane.b32.xlu0 %v1445_v22, %s1565_s29 }
 0x213   : > { %1421 = vrot.lane.b32.xlu1 %v1410_v18, %s1565_s29 }
 0x215   : > { %1456 = vrot.lane.b32.xlu0 %v1445_v22, %s1566_s30 }
 0x217   : > { %712 = vrot.lane.b32.xlu1 %v659_v17, %s1566_s30 }
 0x219   : > { %1461 = vrot.lane.b32.xlu0 %v1445_v22, %s1567_s7 }
 0x21b   : > { %1426 = vrot.lane.b32.xlu1 %v1445_v22, %s1564_s28  ;;  %s251_s28 = scalar_lea.vmem %s1946_s6, %s1236_s25 }
 0x21d   : > { %1466 = vrot.lane.b32.xlu0 %v1445_v22, %s1568_s8 }
 0x21f   : > { %1431 = vrot.lane.b32.xlu1 %v1410_v18, %s1567_s7 }
 0x221   : > { %1471 = vrot.lane.b32.xlu0 %v1445_v22, %s1569_s9 }
 0x223   : > { %1436 = vrot.lane.b32.xlu1 %v1410_v18, %s1568_s8 }
 0x225   : > { %753 = vrot.lane.b32.xlu0 %v657_v21, %s1570_s10 }
 0x227   : > { %1441 = vrot.lane.b32.xlu1 %v1410_v18, %s1569_s9 }
 0x229   : > { %757 = vrot.lane.b32.xlu0 %v659_v17, %s1570_s10 }
 0x22b   : > { %755 = vrot.lane.b32.xlu1 %v658_v19, %s1570_s10 }
 0x22d   : > { %1476 = vrot.lane.b32.xlu0 %v1445_v22, %s1576_s18 }
 0x22f   : > { %759 = vrot.lane.b32.xlu1 %v1573_v25, %s1570_s10 }
 0x27d   : > { %v1412_v23 = vpop.permute.xlu1 %1411 }
 0x27e   : > { %v1413_v24 = vunpack.i.l.bf16 %v1412_v23  ;;  %v1414_v42 = vunpack.i.h.bf16 %v1412_v23 }
 0x27f   : > { %v1807_v26 = vpop.permute.xlu0 %1446 }
 0x280   : > { %v1480_v27 = vpack.i.bf16 %v1413_v24, %v659_v17  ;;  %v1448_v2 = vunpack.i.l.bf16 %v1807_v26  ;;  %v1449_v6 = vunpack.i.h.bf16 %v1807_v26 }
 0x281   : > { %v1417_v28 = vpop.permute.xlu1 %1416 }
 0x282   : > { %1481 = vrot.lane.b32.xlu1 %v1480_v27, %s1576_s18  ;;  %v1418_v31 = vunpack.i.l.bf16 %v1417_v28  ;;  %v1419_v58 = vunpack.i.h.bf16 %v1417_v28  ;;  %v695_v16 = vsel %vm282_vm1, %v1448_v2, %v1449_v6 }
 0x283   : > { %v1810_v29 = vpop.permute.xlu0 %1451 }
 0x284   : > { %v1453_v60 = vunpack.i.l.bf16 %v1810_v29  ;;  %v694_v11 = vsel %vm282_vm1, %v1419_v58, %v1448_v2  ;;  %v696_v8 = vsel %vm282_vm1, %v1449_v6, %v1418_v31  ;;  %v1454_v10 = vunpack.i.h.bf16 %v1810_v29 }
 0x285   : > { %v1422_v30 = vpop.permute.xlu1 %1421  ;;  %v1525_v17 = vpack.i.bf16 %v696_v8, %v695_v16 }
 0x286   : > { %v1423_v32 = vunpack.i.l.bf16 %v1422_v30  ;;  %v1424_v54 = vunpack.i.h.bf16 %v1422_v30  ;;  %v706_v22 = vsel %vm294_vm2, %v1453_v60, %v1454_v10 }
 0x287   : > { %v1457_v33 = vpop.permute.xlu0 %1456 }
 0x288   : > { %v1485_v34 = vpack.i.bf16 %v1423_v32, %v1418_v31  ;;  %v1458_v37 = vunpack.i.l.bf16 %v1457_v33  ;;  %v705_v3 = vsel %vm294_vm2, %v1424_v54, %v1453_v60  ;;  %v1459_v7 = vunpack.i.h.bf16 %v1457_v33 }
 0x289   : > { %v713_v35 = vpop.permute.xlu1 %712  ;;  %v1515_v12 = vpack.i.bf16 %v705_v3, %v694_v11  ;;  %v707_v20 = vsel %vm294_vm2, %v1454_v10, %v1423_v32 }
 0x28a   : > { %1486 = vrot.lane.b32.xlu1 %v1485_v34, %s1576_s18  ;;  %v714_v21 = vsel %vm306_vm3, %v1458_v37, %v1459_v7  ;;  %v715_v19 = vsel %vm306_vm3, %v1459_v7, %v713_v35 }
 0x28b   : > { %v1813_v36 = vpop.permute.xlu0 %1461  ;;  %v1535_v26 = vpack.i.bf16 %v715_v19, %v714_v21 }
 0x28c   : > { %v1463_v38 = vunpack.i.l.bf16 %v1813_v36  ;;  %v1464_v18 = vunpack.i.h.bf16 %v1813_v36 }
 0x28d   : > { %v1427_v39 = vpop.permute.xlu1 %1426 }
 0x28e   : > { %v1490_v40 = vpack.i.bf16 %v1463_v38, %v1458_v37  ;;  %v1428_v46 = vunpack.i.l.bf16 %v1427_v39  ;;  %v1429_v62 = vunpack.i.h.bf16 %v1427_v39  ;;  %v728_v30 = vsel %vm318_vm4, %v1463_v38, %v1464_v18 }
 0x28f   : > { %v1818_v41 = vpop.permute.xlu0 %1466 }
 0x290   : > { %1491 = vrot.lane.b32.xlu0 %v1490_v40, %s1576_s18  ;;  %v1468_v48 = vunpack.i.l.bf16 %v1818_v41  ;;  %v683_v55 = vsel %vm270_vm0, %v1414_v42, %v1428_v46  ;;  %v684_v14 = vsel %vm270_vm0, %v1428_v46, %v1429_v62  ;;  %v685_v15 = vsel %vm270_vm0, %v1429_v62, %v1413_v24 }
 0x291   : > { %v1432_v43 = vpop.permute.xlu1 %1431  ;;  %v1510_v1 = vpack.i.bf16 %v683_v55, %v1573_v25  ;;  %v1520_v13 = vpack.i.bf16 %v685_v15, %v684_v14  ;;  %v1469_v23 = vunpack.i.h.bf16 %v1818_v41  ;;  %v1530_v24 = vpack.i.bf16 %v707_v20, %v706_v22 }
 0x292   : > { %v1434_v44 = vunpack.i.h.bf16 %v1432_v43  ;;  %v1433_v45 = vunpack.i.l.bf16 %v1432_v43 }
 0x293   : > { %v1821_v47 = vpop.permute.xlu0 %1471  ;;  %v739_v32 = vsel %vm330_vm5, %v1468_v48, %v1469_v23 }
 0x294   : > { %v1473_v49 = vunpack.i.l.bf16 %v1821_v47  ;;  %v730_v50 = vsel %vm318_vm4, %v1433_v45, %v1434_v44  ;;  %v729_v27 = vsel %vm318_vm4, %v1464_v18, %v1433_v45  ;;  %v1474_v29 = vunpack.i.h.bf16 %v1821_v47  ;;  %v765_v44 = vld [vmem:[%s1944_s4] sm:$0xff] }
 0x295   : > { %v1437_v51 = vpop.permute.xlu1 %1436  ;;  %v1495_v52 = vpack.i.bf16 %v730_v50, %v713_v35  ;;  %v1540_v31 = vpack.i.bf16 %v729_v27, %v728_v30 }
 0x296   : > { %v1500_v53 = vpack.i.bf16 %v1473_v49, %v1468_v48  ;;  %v1439_v56 = vunpack.i.h.bf16 %v1437_v51  ;;  %v1438_v57 = vunpack.i.l.bf16 %v1437_v51  ;;  %v750_v39 = vsel %vm342_vm6, %v1473_v49, %v1474_v29 }
 0x297   : > { %1496 = vrot.lane.b32.xlu1 %v1495_v52, %s1576_s18  ;;  %v754_v35 = vpop.permute.xlu0 %753 }
 0x298   : > { %1501 = vrot.lane.b32.xlu0 %v1500_v53, %s1576_s18  ;;  %v741_v4 = vsel %vm330_vm5, %v1438_v57, %v1439_v56  ;;  %v740_v28 = vsel %vm330_vm5, %v1469_v23, %v1438_v57 }
 0x299   : > { %v1442_v61 = vpop.permute.xlu1 %1441  ;;  %v1545_v33 = vpack.i.bf16 %v740_v28, %v739_v32 }
 0x29a   : > { %v1444_v63 = vunpack.i.h.bf16 %v1442_v61  ;;  %v1443_v0 = vunpack.i.l.bf16 %v1442_v61 }
 0x29b   : > { %v758_v38 = vpop.permute.xlu0 %757 }
 0x29c   : > { %1511 = vrot.lane.b32.xlu0 %v1510_v1, %s1576_s18  ;;  %v752_v5 = vsel %vm342_vm6, %v1443_v0, %v1444_v63  ;;  %v751_v34 = vsel %vm342_vm6, %v1474_v29, %v1443_v0 }
 0x29d   : > { %v1505_v9 = vpack.i.bf16 %v752_v5, %v741_v4  ;;  %v756_v37 = vpop.permute.xlu1 %755  ;;  %v1550_v40 = vpack.i.bf16 %v751_v34, %v750_v39 }
 0x29e   : > { %v761_v36 = vsel %vm354_vm7, %v754_v35, %v756_v37  ;;  %v762_v41 = vsel %vm354_vm7, %v756_v37, %v758_v38 }
 0x29f   : > { %1506 = vrot.lane.b32.xlu1 %v1505_v9, %s1576_s18  ;;  %v1477_v46 = vpop.permute.xlu0 %1476 }
 0x2a0   : > { %1516 = vrot.lane.b32.xlu0 %v1515_v12, %s1576_s18  ;;  %v1479_v52 = vunpack.i.h.bf16 %v1477_v46  ;;  %v1478_v53 = vunpack.i.l.bf16 %v1477_v46 }
 0x2a1   : > { %v760_v43 = vpop.permute.xlu1 %759 }
 0x2a2   : > { %v763_v45 = vsel %vm354_vm7, %v758_v38, %v760_v43  ;;  %v845_v62 = vsel %vm843_vm11, %v1478_v53, %v1479_v52 }
 0x2a3   : > { %1521 = vrot.lane.b32.xlu1 %v1520_v13, %s1576_s18 }
 0x2a4   : > { %1526 = vrot.lane.b32.xlu0 %v1525_v17, %s1576_s18 }
 0x2a7   : > { %1531 = vrot.lane.b32.xlu1 %v1530_v24, %s1576_s18 }
 0x2a8   : > { %1536 = vrot.lane.b32.xlu0 %v1535_v26, %s1576_s18 }
 0x2ab   : > { %1541 = vrot.lane.b32.xlu1 %v1540_v31, %s1576_s18 }
 0x2ac   : > { %1546 = vrot.lane.b32.xlu0 %v1545_v33, %s1576_s18 }
 0x2af   : > { %1551 = vrot.lane.b32.xlu1 %v1550_v40, %s1576_s18 }
 0x2b0   : > { %837 = vrot.lane.b32.xlu0 %v761_v36, %s1576_s18 }
 0x2b3   : > { %839 = vrot.lane.b32.xlu1 %v762_v41, %s1576_s18 }
 0x2b4   : > { %835 = vrot.lane.b32.xlu0 %v754_v35, %s1576_s18 }
 0x2b7   : > { %841 = vrot.lane.b32.xlu1 %v763_v45, %s1576_s18 }
 0x2b8   : > { %768 = vperm.xlu0 %1409, %v765_v44  }
 0x2f4   : > { %v1482_v47 = vpop.permute.xlu1 %1481 }
 0x2f5   : > { %v1483_v54 = vunpack.i.l.bf16 %v1482_v47  ;;  %v1484_v58 = vunpack.i.h.bf16 %v1482_v47 }
 0x2f7   : > { %v846_v60 = vsel %vm843_vm11, %v1479_v52, %v1483_v54 }
 0x2fc   : > { %v1487_v49 = vpop.permute.xlu1 %1486 }
 0x2fd   : > { %v1489_v63 = vunpack.i.h.bf16 %v1487_v49  ;;  %v1488_v4 = vunpack.i.l.bf16 %v1487_v49 }
 0x302   : > { %v1881_v48 = vpop.permute.xlu0 %1491 }
 0x303   : > { %v1494_v5 = vunpack.i.h.bf16 %v1881_v48  ;;  %v1493_v7 = vunpack.i.l.bf16 %v1881_v48 }
 0x309   : > { %v1885_v42 = vpop.permute.xlu1 %1496 }
 0x30a   : > { %v1883_v50 = vpop.permute.xlu0 %1501  ;;  %v1499_v27 = vunpack.i.h.bf16 %v1885_v42  ;;  %v1498_v31 = vunpack.i.l.bf16 %v1885_v42 }
 0x30b   : > { %v1504_v37 = vunpack.i.h.bf16 %v1883_v50  ;;  %v1503_v46 = vunpack.i.l.bf16 %v1883_v50 }
 0x30e   : > { %v1512_v51 = vpop.permute.xlu0 %1511 }
 0x30f   : > { %v1513_v57 = vunpack.i.l.bf16 %v1512_v51  ;;  %v1514_v0 = vunpack.i.h.bf16 %v1512_v51 }
 0x311   : > { %v1887_v55 = vpop.permute.xlu1 %1506  ;;  %v844_v11 = vsel %vm843_vm11, %v1513_v57, %v1478_v53 }
 0x312   : > { %v1517_v56 = vpop.permute.xlu0 %1516  ;;  %v1508_v42 = vunpack.i.l.bf16 %v1887_v55 }
 0x313   : > { %v1518_v8 = vunpack.i.l.bf16 %v1517_v56  ;;  %v1519_v17 = vunpack.i.h.bf16 %v1517_v56  ;;  %v1509_v56 = vunpack.i.h.bf16 %v1887_v55 }
 0x315   : > { %v1522_v61 = vpop.permute.xlu1 %1521 }
 0x316   : > { %v1524_v1 = vunpack.i.h.bf16 %v1522_v61  ;;  %v1523_v2 = vunpack.i.l.bf16 %v1522_v61  ;;  %v1527_v3 = vpop.permute.xlu0 %1526 }
 0x317   : > { %v1529_v6 = vunpack.i.h.bf16 %v1527_v3  ;;  %v1528_v9 = vunpack.i.l.bf16 %v1527_v3 }
 0x318   : > { %v847_v12 = vsel %vm843_vm11, %v1514_v0, %v1523_v2  ;;  %v849_v14 = vsel %vm843_vm11, %v1524_v1, %v1484_v58  ;;  %v848_v15 = vsel %vm843_vm11, %v1523_v2, %v1524_v1 }
 0x319   : > { %v1210_v10 = vpack.c.bf16 %v847_v12, %v844_v11  ;;  %v1225_v13 = vpack.c.bf16 %v849_v14, %v846_v60  ;;  %v1532_v16 = vpop.permute.xlu1 %1531  ;;  %v1208_v18 = vpack.c.bf16 %v848_v15, %v845_v62  ;;  %v850_v22 = vsel %vm843_vm11, %v1518_v8, %v1528_v9 }
 0x31a   : > { %v1534_v20 = vunpack.i.h.bf16 %v1532_v16  ;;  %v1533_v21 = vunpack.i.l.bf16 %v1532_v16  ;;  %v1537_v19 = vpop.permute.xlu0 %1536  ;;  %v852_v23 = vsel %vm843_vm11, %v1529_v6, %v1488_v4  ;;  %v851_v35 = vsel %vm843_vm11, %v1528_v9, %v1529_v6 }
 0x31b   : > { %v1539_v24 = vunpack.i.h.bf16 %v1537_v19  ;;  %v1538_v26 = vunpack.i.l.bf16 %v1537_v19  ;;  %1226 = vmatpush3.bf16.msra.mxu1 %v1225_v13  ;;  %1209 = vmatprep.subr.bf16.mxu0 %v1208_v18 }
 0x31c   : > { %v853_v28 = vsel %vm843_vm11, %v1519_v17, %v1533_v21  ;;  %v855_v29 = vsel %vm843_vm11, %v1534_v20, %v1489_v63  ;;  %1227 = vmatprep.subr.bf16.mxu1 %v1572_v59  ;;  %v854_v30 = vsel %vm843_vm11, %v1533_v21, %v1534_v20  ;;  %1211 = vmatpush1.bf16.msra.mxu0 %v1210_v10 }
 0x31d   : > { %v1214_v32 = vpack.c.bf16 %v853_v28, %v850_v22  ;;  %v1228_v33 = vpack.c.bf16 %v855_v29, %v852_v23  ;;  %v1542_v34 = vpop.permute.xlu1 %1541  ;;  %v1212_v38 = vpack.c.bf16 %v854_v30, %v851_v35  ;;  %v856_v41 = vsel %vm843_vm11, %v1493_v7, %v1538_v26 }
 0x31e   : > { %v1544_v39 = vunpack.i.h.bf16 %v1542_v34  ;;  %v1543_v40 = vunpack.i.l.bf16 %v1542_v34  ;;  %v1547_v36 = vpop.permute.xlu0 %1546  ;;  %v858_v43 = vsel %vm843_vm11, %v1539_v24, %v1498_v31  ;;  %v857_v54 = vsel %vm843_vm11, %v1538_v26, %v1539_v24 }
 0x31f   : > { %v1549_v44 = vunpack.i.h.bf16 %v1547_v36  ;;  %v1548_v45 = vunpack.i.l.bf16 %v1547_v36  ;;  %1229 = vmatpush3.bf16.msra.mxu1 %v1228_v33  ;;  %1213 = vmatprep.subr.bf16.mxu0 %v1212_v38 }
 0x320   : > { %v859_v47 = vsel %vm843_vm11, %v1494_v5, %v1543_v40  ;;  %v861_v48 = vsel %vm843_vm11, %v1544_v39, %v1499_v27  ;;  %1230 = vmatprep.subr.bf16.mxu1 %v1572_v59  ;;  %v860_v49 = vsel %vm843_vm11, %v1543_v40, %v1544_v39  ;;  %1215 = vmatpush1.bf16.msra.mxu0 %v1214_v32 }
 0x321   : > { %v1218_v51 = vpack.c.bf16 %v859_v47, %v856_v41  ;;  %v1231_v52 = vpack.c.bf16 %v861_v48, %v858_v43  ;;  %v1552_v53 = vpop.permute.xlu1 %1551  ;;  %v1216_v58 = vpack.c.bf16 %v860_v49, %v857_v54  ;;  %v862_v60 = vsel %vm843_vm11, %v1503_v46, %v1548_v45 }
 0x322   : > { %v1554_v50 = vunpack.i.h.bf16 %v1552_v53  ;;  %v1553_v57 = vunpack.i.l.bf16 %v1552_v53  ;;  %v864_v61 = vsel %vm843_vm11, %v1549_v44, %v1508_v42  ;;  %v838_v62 = vpop.permute.xlu0 %837  ;;  %v863_v63 = vsel %vm843_vm11, %v1548_v45, %v1549_v44 }
 0x323   : > { %1232 = vmatpush3.bf16.msra.mxu1 %v1231_v52  ;;  %1217 = vmatprep.subr.bf16.mxu0 %v1216_v58 }
 0x324   : > { %v865_v0 = vsel %vm843_vm11, %v1504_v37, %v1553_v57  ;;  %v867_v1 = vsel %vm843_vm11, %v1554_v50, %v1509_v56  ;;  %1233 = vmatprep.subr.bf16.mxu1 %v1572_v59  ;;  %v866_v55 = vsel %vm843_vm11, %v1553_v57, %v1554_v50  ;;  %1219 = vmatpush1.bf16.msra.mxu0 %v1218_v51  ;;  %v764_v59 = vld [vmem:[%s1943_s3] sm:$0xff] }
 0x325   : > { %v1222_v2 = vpack.c.bf16 %v865_v0, %v862_v60  ;;  %v1234_v3 = vpack.c.bf16 %v867_v1, %v864_v61  ;;  %v840_v4 = vpop.permute.xlu1 %839  ;;  %v1220_v5 = vpack.c.bf16 %v866_v55, %v863_v63 }
 0x326   : > { %v836_v6 = vpop.permute.xlu0 %835  ;;  %v869_v11 = vsel %vm843_vm11, %v838_v62, %v840_v4 }
 0x327   : > { %1221 = vmatprep.subr.bf16.mxu0 %v1220_v5  ;;  %1235 = vmatpush3.bf16.msra.mxu1 %v1234_v3  ;;  %v868_v14 = vsel %vm843_vm11, %v836_v6, %v838_v62 }
 0x328   : > { %1175 = vmatprep.subr.mxu1 %v1573_v25  ;;  %1223 = vmatpush1.bf16.msra.mxu0 %v1222_v2 }
 0x329   : > { %v842_v9 = vpop.permute.xlu1 %841  ;;  %917 = vmatprep.subr.mxu0 %v869_v11 }
 0x32a   : > { %v870_v12 = vsel %vm843_vm11, %v840_v4, %v842_v9 }
 0x32b   : > { %1176 = vmatpush3.msra.mxu1 %v870_v12 }
 0x32c   : > { %1178 = vmatmul.mubr.msk.f32.vlgmr.msra.gmra.mrb[2].mxu1 %vm492_vm10, %v764_v59  ;;  %918 = vmatpush1.msra.mxu0 %v868_v14 }
 0x32d   : > { %1113 = vmatmul.mubr.msk.f32.vlgmr.msra.gmra.mrb[2].mxu0 %vm492_vm10, %v764_v59 }
 0x337   : > { %v769_v25 = vpop.permute.xlu0 %768 }
 0x3ff   : > { %v1038_v15 = vpop.f32.mrb[2].mxu1 }
 0x400   : > { %v1039_v7 = vadd.f32 %v1038_v15, %v769_v25  ;;  %v1179_v8 = vpop.f32.mrb[3].mxu1  ;;  %v967_v10 = vpop.f32.mrb[2].mxu0 }
 0x401   : > { %v968_v16 = vadd.f32 %v967_v10, %v769_v25  ;;  %v969_v17 = vpop.f32.mrb[3].mxu0 }
 0x402   : > { %v1044_v13 = vmax.f32 %v1039_v7, 0.0  ;;  %v970_v20 = vadd.f32 %v969_v17, %v769_v25 }
 0x403   : > { %v1042_v21 = vmax.f32 %v968_v16, 0.0 }
 0x404   : > { %1047 = vst [vmem:[%s251_s28 + $0x10] sm:$0xff] %v1044_v13  ;;  %v1043_v19 = vmax.f32 %v970_v20, 0.0 }
 0x405   : > { %1045 = vst [vmem:[%s251_s28] sm:$0xff] %v1042_v21 }
 0x406   : > { %1046 = vst [vmem:[%s251_s28 + $0x8] sm:$0xff] %v1043_v19 }
 0x407 PF: > { %s16_s21 = sadd.s32 1, %s1561_s21  }
 0x408   : > { %p13_p4 = scmp.ge.s32.totalorder %s16_s21, 4  }
 0x40a   :  { %15 = sbr.rel (!%p13_p4) target bundleno = 1 (0x1), region = 74 }

</bundles_post_ra>
